<compile_context>
chip_gen: v7x
topology: tpu7x:2x2x1
jax: 0.10.0
libtpu: 0.0.40
codegen_flags: <defaults>
</compile_context>

<pallas_src>
import math

import jax
import jax.numpy as jnp
from jax.experimental import pallas as pl
from jax.experimental.pallas import tpu as pltpu


# Below this many output bytes the fixed pallas_call launch / DMA-setup cost
# dominates; plain XLA broadcast already runs at HBM bandwidth.
_PALLAS_MIN_OUT_BYTES = 256 * 1024


def _prompt_broadcast_kernel(row_ref, out_ref):
    """One grid step = one row-tile of the lane-dense output slab.

    row_ref : VMEM (1, L)          -- repeated prompt pattern (resident across steps)
    out_ref : VMEM (tile_rows, L)  -- output tile; every row is identical
    """
    out_ref[...] = jnp.broadcast_to(row_ref[...], out_ref.shape)


def _pick_tile_rows(n_rows, lane_width):
    """Row-tile size: ~1 MiB per output block (=> ~2 MiB live with the pipeline
    double buffer, safe inside v5e's 16 MiB scoped-VMEM default), rounded to a
    multiple of 8, and at least 2 grid steps when possible so v7x's two
    TensorCores can split the 'parallel' axis."""
    budget_rows = max(8, (1 << 20) // (lane_width * 4))
    two_step_rows = max(8, -(-n_rows // 2))
    tile = min(n_rows, budget_rows, two_step_rows)
    if tile >= n_rows:
        return n_rows                     # full extent: always a legal block
    return max(8, (tile // 8) * 8)        # multiple of 8: legal sublane block


def _label_prompt_pallas(table, batch_size):
    """Tile `table` (num_prompt, hidden) across the batch with a Pallas kernel."""
    num_prompt, hidden = table.shape
    flat = num_prompt * hidden
    total = batch_size * flat

    # Lane-dense row width: multiple of 128 (full-width vst, 128-lane DMA rows)
    # and of `flat` (so every slab row is the same repeated prompt pattern).
    lane_width = math.lcm(flat, 128)
    n_rows = pl.cdiv(total, lane_width)

    # The gathered indices are always arange(num_prompt) == the whole table, so
    # the "gather" is trace-time layout plumbing: build one repeated super-row.
    super_row = jnp.tile(table.reshape(-1), lane_width // flat).reshape(1, lane_width)

    tile_rows = _pick_tile_rows(n_rows, lane_width)
    grid = (pl.cdiv(n_rows, tile_rows),)

    slab = pl.pallas_call(
        _prompt_broadcast_kernel,
        out_shape=jax.ShapeDtypeStruct((n_rows, lane_width), table.dtype),
        grid=grid,
        in_specs=[
            # Same tiny block every step -> stays resident in VMEM.
            pl.BlockSpec((1, lane_width), lambda i: (0, 0)),
        ],
        out_specs=pl.BlockSpec((tile_rows, lane_width), lambda i: (i, 0)),
        compiler_params=pltpu.CompilerParams(dimension_semantics=("parallel",)),
    )(super_row)

    flat_out = slab.reshape(-1)
    if n_rows * lane_width != total:
        flat_out = flat_out[:total]       # padded tail only when batch*flat % L != 0
    return flat_out.reshape(batch_size, num_prompt, hidden)


def _label_prompt_call(table, batch_size, force_pallas=False):
    num_prompt, hidden = table.shape
    out_bytes = batch_size * num_prompt * hidden * table.dtype.itemsize

    # The mask is a constant: building it in the kernel would add a second,
    # lane-sparse (2-5 lane wide) output stream.  Emit it from the wrapper.
    mask = jnp.ones((batch_size, num_prompt), jnp.float32)

    if not force_pallas and out_bytes < _PALLAS_MIN_OUT_BYTES:
        # Tiny output: pallas_call launch cost dominates; let XLA broadcast.
        prompt = jnp.broadcast_to(table[None], (batch_size, num_prompt, hidden))
        return prompt, mask

    return _label_prompt_pallas(table, batch_size), mask


class LabelPrompt:
    """JAX/Pallas re-implementation of the PyTorch LabelPrompt forward pass."""

    def __init__(self, hidden_size, key):
        k1, k2, k3, k4, k5 = jax.random.split(key, 5)
        # Deterministic synthetic init (mirrors nn.Embedding(2/2/5, hidden)).
        self.expired_label_embedding = jax.random.normal(k1, (2, hidden_size), jnp.float32)
        self.readmittion_label_embedding = jax.random.normal(k2, (2, hidden_size), jnp.float32)
        self.los_label_embedding = jax.random.normal(k3, (5, hidden_size), jnp.float32)
        # self.trans = nn.Linear(768, hidden) exists in __init__ but is never used
        # in forward; initialized here only for shape fidelity.
        self.trans_w = jax.random.normal(k4, (768, hidden_size), jnp.float32) * 0.02
        self.trans_b = jax.random.normal(k5, (hidden_size,), jnp.float32) * 0.02
        # TODO(synk): init_label_prompt_by_bert (PackedBert embeddings) is a
        # checkpoint-dependent init, not reproducible in-script; random init used.

    def __call__(self, batch_size, label_key, force_pallas=False):
        if label_key == "expired":
            table = self.expired_label_embedding
        elif label_key == "readmittion":
            # NOTE: the original PyTorch forward (faithfully) reuses the
            # *expired* table for 'readmittion'.
            table = self.expired_label_embedding
        elif label_key == "los":
            table = self.los_label_embedding
        else:
            raise AssertionError(f"label_key {label_key} is unrecoginzied")
        return _label_prompt_call(table, batch_size, force_pallas=force_pallas)


if __name__ == "__main__":
    hidden_size = 32
    module = LabelPrompt(hidden_size, jax.random.PRNGKey(0))

    cases = (
        ("expired", 2, module.expired_label_embedding),
        ("readmittion", 2, module.expired_label_embedding),
        ("los", 5, module.los_label_embedding),
    )

    ok = True
    # batch=2 matches the module's demo size; batch=13 also exercises
    # multi-row tiles and the padded-slab path (13*160 is not a multiple of 640).
    for batch_size in (2, 13):
        for label_key, num_prompt, table in cases:
            # force_pallas=True exercises the kernel (the wrapper would
            # otherwise bypass Pallas at these tiny sizes); False checks the
            # wrapper fast path.
            for force_pallas in (True, False):
                prompt, mask = module(batch_size, label_key, force_pallas=force_pallas)
                prompt = jax.block_until_ready(prompt)
                mask = jax.block_until_ready(mask)

                ref_prompt = jnp.broadcast_to(
                    table[None], (batch_size, num_prompt, hidden_size)
                )
                ref_mask = jnp.ones((batch_size, num_prompt), jnp.float32)

                ok &= prompt.shape == (batch_size, num_prompt, hidden_size)
                ok &= mask.shape == (batch_size, num_prompt)
                ok &= bool(jnp.array_equal(prompt, ref_prompt))
                ok &= bool(jnp.array_equal(mask, ref_mask))

    print("KERNEL_OK" if ok else "KERNEL_MISMATCH")
</pallas_src>

<mosaic_0001>
module attributes {stable_mosaic.version = 11 : i64} {
  func.func @_prompt_broadcast_kernel(%arg0: i32, %arg1: memref<1x128xf32, #tpu.memory_space<vmem>>, %arg2: memref<1x128xf32, #tpu.memory_space<vmem>>) attributes {dimension_semantics = [#tpu.dimension_semantics<parallel>], iteration_bounds = array<i64: 1>, scalar_prefetch = 0 : i64, scratch_operands = 0 : i64, tpu.core_type = #tpu.core_type<tc>, window_params = [{pipeline_mode = #tpu.pipeline_mode<synchronous>, transform_indices = @transform_0, window_bounds = array<i64: 1, 128>}, {transform_indices = @transform_1, window_bounds = array<i64: 1, 128>}]} {
    %c0 = arith.constant 0 : index
    %c0_0 = arith.constant 0 : index
    %0 = vector.load %arg1[%c0, %c0_0] : memref<1x128xf32, #tpu.memory_space<vmem>>, vector<1x128xf32>
    %c0_1 = arith.constant 0 : index
    %c0_2 = arith.constant 0 : index
    %1 = vector.load %arg2[%c0_1, %c0_2] : memref<1x128xf32, #tpu.memory_space<vmem>>, vector<1x128xf32>
    tpu.vector_store %arg2[%c0_1, %c0_2], %0 {strides = array<i32>} : memref<1x128xf32, #tpu.memory_space<vmem>>, vector<1x128xf32>,
    return
  }
  func.func @transform_0(%arg0: i32) -> (i32, i32) {
    %c0_i32 = arith.constant 0 : i32
    %c0_i32_0 = arith.constant 0 : i32
    %c0_i32_1 = arith.constant 0 : i32
    return %c0_i32, %c0_i32_0 : i32, i32
  }
  func.func @transform_1(%arg0: i32) -> (i32, i32) {
    %c0_i32 = arith.constant 0 : i32
    %c0_i32_0 = arith.constant 0 : i32
    return %arg0, %c0_i32 : i32, i32
  }
}

</mosaic_0001>

<bundles_post_ra>
// kernel: tpu_custom_call.1
= control target key start
LH: loop header
LB: loop body
LE: loop exit
PB: predicated region body
PF: predicated region fallthrough
CT: control target
= control target key end

     0   :  { %6 = vsyncpa [#allocation3], 0  ;;  %s124_s0 = inlined_call_operand.hbm [shape: f32[1,128], index: 0, kind: input, shape index: {}]   ;;  %s125_s1 = inlined_call_operand.hbm [shape: f32[1,128], index: 1, kind: output, shape index: {}]  }
   0x1   :  { %7 = vsyncpa [#allocation4], 0  ;;  %s88_s6 = smov [#allocation2]   ;;  %s40_s10 = scalar_lea.hbm %s124_s0, 16 }
   0x2   :  { %s14_s7 = sshll.u32 %s88_s6, 4  ;;  %p41_p0 = scmp.ne.s32.totalorder %s124_s0, %s40_s10  ;;  %s15_s7 = int_to_ptr.vmem [resolvable:$true] %s14_s7 }
   0x3   :  { %p44_p1 = scmp.lt.u32.totalorder %s40_s10, %s124_s0 }
   0x5   :  { %p46_p2 = pnand %p44_p1, %p41_p0 }
   0x7   :  { %49 = shalt.err (!%p46_p2)
}
   0x8   :  { %s50_s15 = scalar_lea.vmem %s15_s7, 16  ;;  %s54_s16 = scalar_lea.vmem %s15_s7, 32 }
   0x9   :  { %p51_p3 = scmp.ne.s32.totalorder %s15_s7, %s50_s15  ;;  %p55_p4 = scmp.lt.s32.totalorder %s15_s7, %s15_s7 }
   0xa   :  { %p56_p5 = scmp.lt.s32.totalorder %s54_s16, %s50_s15 }
   0xc   :  { %p57_p6 = por %p56_p5, %p55_p4 }
   0xe   :  { %p58_p7 = pnand %p57_p6, %p51_p3 }
  0x10   :  { %61 = shalt.err (!%p58_p7)
}
  0x11   :  { %17 = dma.hbm_to_vmem [thread:$0]  %s124_s0, 16, %s15_s7, [#allocation3]  }
  0x12   :  { %84 = dma.done.wait [#allocation3], 16  }
  0x13   :  { %85 = vsyncadd [#allocation3], 4294967280  ;;  %s89_s19 = smov [#allocation5]   ;;  %v21_v0 = vld [vmem:[#allocation2] sm:$0x1] }
  0x14   :  { %s29_s20 = sshll.u32 %s89_s19, 4  ;;  %22 = vst [vmem:[#allocation5] sm:$0x1] %v21_v0  ;;  %s30_s20 = int_to_ptr.vmem [resolvable:$true] %s29_s20 }
  0x15   :  { %s62_s21 = scalar_lea.vmem %s30_s20, 16  ;;  %s66_s22 = scalar_lea.vmem %s30_s20, 32 }
  0x16   :  { %p63_p8 = scmp.ne.s32.totalorder %s30_s20, %s62_s21  ;;  %p67_p9 = scmp.lt.s32.totalorder %s30_s20, %s30_s20 }
  0x17   :  { %p68_p10 = scmp.lt.s32.totalorder %s66_s22, %s62_s21 }
  0x19   :  { %p69_p11 = por %p68_p10, %p67_p9 }
  0x1b   :  { %p70_p12 = pnand %p69_p11, %p63_p8 }
  0x1d   :  { %73 = shalt.err (!%p70_p12)
}
  0x1e   :  { %s74_s25 = scalar_lea.hbm %s125_s1, 16 }
  0x1f   :  { %p75_p13 = scmp.ne.s32.totalorder %s125_s1, %s74_s25  ;;  %p78_p0 = scmp.lt.u32.totalorder %s74_s25, %s125_s1 }
  0x21   :  { %p80_p1 = pnand %p78_p0, %p75_p13 }
  0x23   :  { %83 = shalt.err (!%p80_p1)
}
  0x24   :  { %32 = dma.vmem_to_hbm [thread:$0]  %s30_s20, 16, %s125_s1, [#allocation4]  }
  0x25   :  { %86 = dma.done.wait [#allocation4], 16  }
  0x26   :  { %87 = vsyncadd [#allocation4], 4294967280 }
  0x27   :  { %36 = vsyncpa [#allocation3], 1 }
  0x28   :  { %37 = vsyncpa [#allocation4], 1 }

</bundles_post_ra>
